<compile_context>
chip_gen: v7x
topology: tpu7x:2x2x1
jax: 0.10.0
libtpu: 0.0.40
codegen_flags: <defaults>
</compile_context>

<pallas_src>
import math

import jax
import jax.numpy as jnp
from jax.experimental import pallas as pl
from jax.experimental.pallas import tpu as pltpu


def _round_up(a, b):
    return (a + b - 1) // b * b


def _divisors(n):
    out = set()
    d = 1
    while d * d <= n:
        if n % d == 0:
            out.add(d)
            out.add(n // d)
        d += 1
    return sorted(out)


def _pick_group(R, K, Wout, pmat_itemsize):
    """Rows packed per matmul row.  G must divide R; prefer a lane-dense output
    width (G*Wout % 128 == 0) and an MXU-deep contraction (G*K >= 256), while
    keeping the constant block-diagonal pooling matrix small."""
    best, best_key = 1, None
    for G in _divisors(R):
        Kp, Np = G * K, G * Wout
        if Np > 1024:                                   # don't over-pack the output
            continue
        if Kp * Np * pmat_itemsize > (2 << 20):         # keep the weight matrix small
            continue
        # lane-dense output > deep contraction (capped at 256) > full output
        # vreg (capped at 128) > smallest G (block-diag MXU work grows with G)
        key = (Np % 128 == 0, min(Kp, 256), min(Np, 128), -G)
        if best_key is None or key > best_key:
            best, best_key = G, key
    return best


def _make_kernel(post_scale, lhs_dtype, precision):
    def kernel(x_ref, p_ref, o_ref):
        lhs = x_ref[...]
        if lhs.dtype != lhs_dtype:          # only for exotic input dtypes
            lhs = lhs.astype(lhs_dtype)
        acc = jnp.dot(lhs, p_ref[...],
                      preferred_element_type=jnp.float32,
                      precision=precision)
        if post_scale != 1.0:               # only when the scale isn't exact in weights
            acc = acc * jnp.float32(post_scale)
        o_ref[...] = acc.astype(o_ref.dtype)
    return kernel


def avg_forward(x, down_n=2):
    """AVG.forward: adaptive_avg_pool2d(x, (H//down_n, W//down_n)), NCHW in/out."""
    B, C, H, W = x.shape
    down = int(down_n)
    Hout, Wout = H // down, W // down
    if Hout * down != H or Wout * down != W:
        # TODO(synk): general adaptive_avg_pool2d (non-divisible H/W -> variable
        # window sizes) is not implemented; only the exact-stride case the
        # module is used with.
        raise NotImplementedError("H and W must be divisible by down_n")

    # ---- dtypes --------------------------------------------------------------
    x_dtype = jnp.dtype(x.dtype)
    if x_dtype in (jnp.dtype(jnp.bfloat16), jnp.dtype(jnp.float32)):
        lhs_dtype = x_dtype                 # feed bf16 / f32 straight to the MXU
    else:
        lhs_dtype = jnp.dtype(jnp.float32)  # cast exotic dtypes once, in-kernel
    pmat_dtype = lhs_dtype
    itemsize = x_dtype.itemsize

    scale = 1.0 / float(down * down)
    # fold the 1/down^2 scale into the weights when exact in the weight dtype
    fold = (pmat_dtype == jnp.dtype(jnp.float32)) or ((down & (down - 1)) == 0)
    pmat_val = scale if fold else 1.0
    post_scale = 1.0 if fold else scale

    # ---- packing: G output rows per matmul row -------------------------------
    K = down * W                    # source elements of one output row (contiguous)
    R = B * C * Hout                # one output row per (b, c, h_out)
    G = _pick_group(R, K, Wout, jnp.dtype(pmat_dtype).itemsize)
    Kp, Np = G * K, G * Wout        # packed contraction depth / output width
    Rp = R // G                     # packed rows

    # pure row-major reshape: the G*down source rows of every packed row are
    # already contiguous, so this is a bitcast-level reshape (no data movement).
    x2 = x.reshape(Rp, Kp)

    # block-diagonal pooling matrix:
    #   P[g*K + d*W + w, g*Wout + wo] = pmat_val  iff  w // down == wo
    w_idx = jnp.tile(jnp.arange(W) // down, down)                  # (K,)
    base = (w_idx[:, None] == jnp.arange(Wout)[None, :])           # (K, Wout)
    grp_r = jnp.repeat(jnp.arange(G), K)                           # (Kp,)
    grp_c = jnp.repeat(jnp.arange(G), Wout)                        # (Np,)
    pmat = jnp.tile(base, (G, G)) & (grp_r[:, None] == grp_c[None, :])
    pmat = (pmat.astype(jnp.float32) * pmat_val).astype(pmat_dtype)

    # ---- tiling: block size from the real (lane/sublane padded) footprint ----
    try:
        vmem_cap = int(pltpu.get_tpu_info().vmem_capacity_bytes)
    except Exception:
        vmem_cap = 64 << 20                                   # conservative (v7x)
    block_cap = (4 << 20) if vmem_cap <= (64 << 20) else (8 << 20)

    sub = {4: 8, 2: 16, 1: 32}.get(itemsize, 8)               # sublane multiple
    row_bytes = (_round_up(Kp, 128) * itemsize                # input row in VMEM
                 + _round_up(Np, 128) * itemsize)             # output row in VMEM
    cap_rows = max(sub, block_cap // row_bytes // sub * sub)

    if Rp <= cap_rows:
        TR = Rp
        # give the v7x megacore two parallel steps when there is enough work
        if Rp * row_bytes >= (2 << 20) and Rp % (2 * sub) == 0:
            TR = Rp // 2
    else:
        TR = None
        for d in reversed(_divisors(Rp)):                     # avoid any pad/tail
            if d <= cap_rows and d % sub == 0:
                TR = d
                break
        if TR is None or TR * row_bytes < block_cap // 4:
            TR = cap_rows                                     # masked tail block
    n_steps = pl.cdiv(Rp, TR)

    # VMEM budget: double-buffered in/out blocks + (double-buffered) weights.
    pmat_bytes = (_round_up(Kp, sub) * _round_up(Np, 128)
                  * jnp.dtype(pmat_dtype).itemsize)
    need = 2 * TR * row_bytes + 2 * pmat_bytes + (2 << 20)
    vmem_limit = int(min(max(need, 32 << 20), (vmem_cap * 3) // 4))

    kernel = _make_kernel(
        post_scale, lhs_dtype,
        jax.lax.Precision.HIGHEST if lhs_dtype == jnp.dtype(jnp.float32) else None)

    cost = pl.CostEstimate(
        flops=2 * Rp * Kp * Np,
        transcendentals=0,
        bytes_accessed=(Rp * Kp + Rp * Np) * itemsize
        + Kp * Np * jnp.dtype(pmat_dtype).itemsize)

    out = pl.pallas_call(
        kernel,
        out_shape=jax.ShapeDtypeStruct((Rp, Np), x.dtype),
        grid=(n_steps,),
        in_specs=[
            pl.BlockSpec((TR, Kp), lambda i: (i, 0)),
            # constant index_map -> the weight DMA is issued once and the block
            # stays resident; only the extra buffer (<= ~256 KiB) is "wasted".
            pl.BlockSpec((Kp, Np), lambda i: (0, 0)),
        ],
        out_specs=pl.BlockSpec((TR, Np), lambda i: (i, 0)),
        compiler_params=pltpu.CompilerParams(
            dimension_semantics=("parallel",),
            vmem_limit_bytes=vmem_limit,
        ),
        cost_estimate=cost,
    )(x2, pmat)

    # (Rp, G*Wout) row-major is elementwise identical to (R, Wout) row-major.
    return out.reshape(B, C, Hout, Wout)


if __name__ == "__main__":
    key = jax.random.PRNGKey(0)
    B, C, H, W = 2, 4, 16, 16
    down_n = 2

    x = jax.random.normal(key, (B, C, H, W), dtype=jnp.float32)

    # f32 path
    y = jax.block_until_ready(avg_forward(x, down_n))
    ref = x.reshape(B, C, H // down_n, down_n, W // down_n, down_n).mean(axis=(3, 5))
    assert y.shape == (B, C, H // down_n, W // down_n), y.shape
    assert bool(jnp.all(jnp.isfinite(y)))
    assert bool(jnp.allclose(y, ref, rtol=1e-5, atol=1e-6)), float(
        jnp.max(jnp.abs(y - ref)))

    # bf16 path (bf16 LHS / bf16 weights straight through the MXU, f32 accumulate)
    xb = x.astype(jnp.bfloat16)
    yb = jax.block_until_ready(avg_forward(xb, down_n))
    refb = xb.astype(jnp.float32).reshape(
        B, C, H // down_n, down_n, W // down_n, down_n).mean(axis=(3, 5))
    assert yb.dtype == jnp.bfloat16
    assert bool(jnp.allclose(yb.astype(jnp.float32), refb, rtol=8e-3, atol=8e-3))

    print("KERNEL_OK")
</pallas_src>

<mosaic_0001>
module attributes {stable_mosaic.version = 11 : i64} {
  func.func @kernel(%arg0: i32, %arg1: memref<4x512xf32, #tpu.memory_space<vmem>>, %arg2: memref<512x128xf32, #tpu.memory_space<vmem>>, %arg3: memref<4x128xf32, #tpu.memory_space<vmem>>) attributes {dimension_semantics = [#tpu.dimension_semantics<parallel>], iteration_bounds = array<i64: 1>, scalar_prefetch = 0 : i64, scratch_operands = 0 : i64, tpu.core_type = #tpu.core_type<tc>, window_params = [{transform_indices = @transform_0, window_bounds = array<i64: 4, 512>}, {pipeline_mode = #tpu.pipeline_mode<synchronous>, transform_indices = @transform_1, window_bounds = array<i64: 512, 128>}, {transform_indices = @transform_2, window_bounds = array<i64: 4, 128>}]} {
    %c0 = arith.constant 0 : index
    %c0_0 = arith.constant 0 : index
    %0 = vector.load %arg1[%c0, %c0_0] : memref<4x512xf32, #tpu.memory_space<vmem>>, vector<4x512xf32>
    %c0_1 = arith.constant 0 : index
    %c0_2 = arith.constant 0 : index
    %1 = vector.load %arg2[%c0_1, %c0_2] : memref<512x128xf32, #tpu.memory_space<vmem>>, vector<512x128xf32>
    %cst = arith.constant dense<0.000000e+00> : vector<4x128xf32>
    %2 = tpu.matmul %0, %1, %cst {dimension_numbers = #tpu.dot_dimension_numbers<[1], [0], [0], [1], [0, 0, 1, 1], [], []>, precision = #tpu.contract_precision<fp32>} : vector<4x512xf32>, vector<512x128xf32>, vector<4x128xf32> -> vector<4x128xf32>
    %c0_3 = arith.constant 0 : index
    %c0_4 = arith.constant 0 : index
    %3 = vector.load %arg3[%c0_3, %c0_4] : memref<4x128xf32, #tpu.memory_space<vmem>>, vector<4x128xf32>
    tpu.vector_store %arg3[%c0_3, %c0_4], %2 {strides = array<i32>} : memref<4x128xf32, #tpu.memory_space<vmem>>, vector<4x128xf32>,
    return
  }
  func.func @transform_0(%arg0: i32) -> (i32, i32) {
    %c0_i32 = arith.constant 0 : i32
    %c0_i32_0 = arith.constant 0 : i32
    return %arg0, %c0_i32 : i32, i32
  }
  func.func @transform_1(%arg0: i32) -> (i32, i32) {
    %c0_i32 = arith.constant 0 : i32
    %c0_i32_0 = arith.constant 0 : i32
    %c0_i32_1 = arith.constant 0 : i32
    return %c0_i32, %c0_i32_0 : i32, i32
  }
  func.func @transform_2(%arg0: i32) -> (i32, i32) {
    %c0_i32 = arith.constant 0 : i32
    %c0_i32_0 = arith.constant 0 : i32
    return %arg0, %c0_i32 : i32, i32
  }
}

</mosaic_0001>

<bundles_post_ra>
// kernel: tpu_custom_call.1
= control target key start
LH: loop header
LB: loop body
LE: loop exit
PB: predicated region body
PF: predicated region fallthrough
CT: control target
= control target key end

     0   :  { %7 = vsyncpa [#allocation3], 0  ;;  %s3698_s0 = inlined_call_operand.hbm [shape: f32[4,512], index: 0, kind: input, shape index: {}]   ;;  %s3699_s1 = inlined_call_operand.hbm [shape: f32[512,128], index: 1, kind: input, shape index: {}]   ;;  %s3700_s2 = inlined_call_operand.hbm [shape: f32[4,128], index: 2, kind: output, shape index: {}]  }
   0x1   :  { %8 = vsyncpa [#allocation6], 0 }
   0x2   :  { %9 = vsyncpa [#allocation4], 0  ;;  %s2734_s9 = smov [#allocation2]   ;;  %s2735_s11 = smov [#allocation5]  }
   0x3   :  { %s16_s10 = sshll.u32 %s2734_s9, 4  ;;  %s25_s12 = sshll.u32 %s2735_s11, 4  ;;  %s17_s10 = int_to_ptr.vmem [resolvable:$true] %s16_s10  ;;  %s2754_s12 = int_to_ptr.vmem [resolvable:$true] %s25_s12 }
   0x4   :  { %s2662_s15 = scalar_lea.hbm %s3698_s0, 256 }
   0x5   :  { %p2663_p0 = scmp.ne.s32.totalorder %s3698_s0, %s2662_s15  ;;  %p2666_p1 = scmp.lt.u32.totalorder %s2662_s15, %s3698_s0 }
   0x7   :  { %p2668_p2 = pnand %p2666_p1, %p2663_p0 }
   0x9   :  { %2671 = shalt.err (!%p2668_p2)
}
   0xa   :  { %s2672_s20 = scalar_lea.vmem %s17_s10, 256  ;;  %p2677_p4 = scmp.lt.s32.totalorder %s17_s10, %s17_s10 }
   0xb   :  { %p2673_p3 = scmp.ne.s32.totalorder %s17_s10, %s2672_s20  ;;  %p2678_p5 = scmp.lt.s32.totalorder %s2672_s20, %s2672_s20 }
   0xd   :  { %p2679_p6 = por %p2678_p5, %p2677_p4 }
   0xf   :  { %p2680_p7 = pnand %p2679_p6, %p2673_p3 }
  0x11   :  { %2683 = shalt.err (!%p2680_p7)
}
  0x12   :  { %19 = dma.hbm_to_vmem [thread:$0]  %s3698_s0, 256, %s17_s10, [#allocation3]  }
  0x13   :  { %s2684_s25 = scalar_lea.hbm %s3699_s1, 8192 }
  0x14   :  { %p2685_p8 = scmp.ne.s32.totalorder %s3699_s1, %s2684_s25  ;;  %p2688_p9 = scmp.lt.u32.totalorder %s2684_s25, %s3699_s1 }
  0x16   :  { %p2690_p10 = pnand %p2688_p9, %p2685_p8 }
  0x18   :  { %2693 = shalt.err (!%p2690_p10)
}
  0x19   :  { %s2694_s30 = scalar_lea.vmem %s2754_s12, 8192  ;;  %p2699_p12 = scmp.lt.s32.totalorder %s2754_s12, %s2754_s12 }
  0x1a   :  { %p2695_p11 = scmp.ne.s32.totalorder %s2754_s12, %s2694_s30  ;;  %p2700_p13 = scmp.lt.s32.totalorder %s2694_s30, %s2694_s30 }
  0x1c   :  { %p2701_p0 = por %p2700_p13, %p2699_p12 }
  0x1e   :  { %p2702_p1 = pnand %p2701_p0, %p2695_p11 }
  0x20   :  { %2705 = shalt.err (!%p2702_p1)
}
  0x21   :  { %s2736_s0 = smov 128   ;;  %s2737_s3 = smov 8  }
  0x22   :  { %31 = dma.hbm_to_vmem [thread:$0]  %s3699_s1, 8192, %s2754_s12, [#allocation6], %s2736_s0, %s2736_s0, %s2737_s3  }
  0x23   :  { %2728 = dma.done.wait [#allocation3], 256  }
  0x24   :  { %2729 = vsyncadd [#allocation3], 4294967040 }
  0x25   :  { %2730 = dma.done.wait [#allocation6], 8192  }
  0x26   :  { %2731 = vsyncadd [#allocation6], 4294959104  ;;  %v56_v0 = vld [vmem:[#allocation5 + $0x80] sm:$0xff]  ;;  %v57_v1 = vld [vmem:[#allocation5 + $0x88] sm:$0xff]  ;;  %s2738_s1 = smov [#allocation7]  }
  0x27   :  { %v40_v2 = vld [vmem:[#allocation5] sm:$0xff]  ;;  %v159_v3 = vand.u32 4294901760, %v56_v0  ;;  %v162_v4 = vand.u32 4294901760, %v57_v1  ;;  %v41_v5 = vld [vmem:[#allocation5 + $0x8] sm:$0xff]  ;;  %v58_v7 = vld [vmem:[#allocation5 + $0x90] sm:$0xff]  ;;  %s1841_s6 = sshll.u32 %s2738_s1, 4  ;;  %s1842_s6 = int_to_ptr.vmem [resolvable:$true] %s1841_s6 }
  0x28   :  { %v111_v6 = vand.u32 4294901760, %v40_v2  ;;  %v59_v8 = vld [vmem:[#allocation5 + $0x98] sm:$0xff]  ;;  %v114_v9 = vand.u32 4294901760, %v41_v5  ;;  %v165_v10 = vand.u32 4294901760, %v58_v7  ;;  %v42_v12 = vld [vmem:[#allocation5 + $0x10] sm:$0xff]  ;;  %v60_v18 = vld [vmem:[#allocation5 + $0xa0] sm:$0xff]  ;;  %p2711_p3 = scmp.lt.s32.totalorder %s1842_s6, %s1842_s6 }
  0x29   :  { %v168_v11 = vand.u32 4294901760, %v59_v8  ;;  %v43_v13 = vld [vmem:[#allocation5 + $0x18] sm:$0xff]  ;;  %v2785_v14 = vpack.c.bf16 %v162_v4, %v159_v3  ;;  %v117_v16 = vand.u32 4294901760, %v42_v12  ;;  %v61_v19 = vld [vmem:[#allocation5 + $0xa8] sm:$0xff]  ;;  %v44_v23 = vld [vmem:[#allocation5 + $0x20] sm:$0xff]  ;;  %v171_v29 = vand.u32 4294901760, %v60_v18 }
  0x2a   :  { %v2787_v15 = vsub.f32 %v40_v2, %v111_v6  ;;  %v120_v17 = vand.u32 4294901760, %v43_v13  ;;  %v2789_v20 = vpack.c.bf16 %v114_v9, %v111_v6  ;;  %v2791_v21 = vsub.f32 %v41_v5, %v114_v9  ;;  %v45_v24 = vld [vmem:[#allocation5 + $0x28] sm:$0xff]  ;;  %v62_v37 = vld [vmem:[#allocation5 + $0xb0] sm:$0xff]  ;;  %v63_v42 = vld [vmem:[#allocation5 + $0xb8] sm:$0xff]  ;;  %s2706_s7 = scalar_lea.vmem %s1842_s6, 64 }
  0x2b   :  { %v2793_v22 = vpack.c.bf16 %v168_v11, %v165_v10  ;;  %2272 = vmatprep.subr.bf16.mxu0 %v2785_v14  ;;  %v2796_v25 = vsub.f32 %v58_v7, %v165_v10  ;;  %v2798_v26 = vsub.f32 %v59_v8, %v168_v11  ;;  %v2802_v28 = vsub.f32 %v42_v12, %v117_v16  ;;  %v46_v55 = vld [vmem:[#allocation5 + $0x30] sm:$0xff]  ;;  %v47_v56 = vld [vmem:[#allocation5 + $0x38] sm:$0xff]  ;;  %v64_v5 = vld [vmem:[#allocation5 + $0xc0] sm:$0xff]  ;;  %p2707_p2 = scmp.ne.s32.totalorder %s1842_s6, %s2706_s7  ;;  %p2712_p4 = scmp.lt.s32.totalorder %s2706_s7, %s2706_s7 }
  0x2c   :  { %v2800_v27 = vpack.c.bf16 %v120_v17, %v117_v16  ;;  %2274 = vmatpush3.bf16.msra.mxu0 %v2789_v20  ;;  %v174_v30 = vand.u32 4294901760, %v61_v19  ;;  %v2805_v31 = vsub.f32 %v56_v0, %v159_v3  ;;  %v2807_v32 = vsub.f32 %v57_v1, %v162_v4  ;;  %v65_v6 = vld [vmem:[#allocation5 + $0xc8] sm:$0xff]  ;;  %v48_v11 = vld [vmem:[#allocation5 + $0x40] sm:$0xff] }
  0x2d   :  { %2276 = vmatprep.subr.bf16.mxu0 %v2793_v22  ;;  %v123_v33 = vand.u32 4294901760, %v44_v23  ;;  %v126_v34 = vand.u32 4294901760, %v45_v24  ;;  %v3716_v35 = vand.u32 4294901760, %v2787_v15  ;;  %v3715_v36 = vand.u32 4294901760, %v2791_v21  ;;  %p2713_p5 = por %p2712_p4, %p2711_p3 }
  0x2e   :  { %v2812_v38 = vsub.f32 %v43_v13, %v120_v17  ;;  %v2814_v39 = vpack.c.bf16 %v174_v30, %v171_v29  ;;  %v2816_v40 = vsub.f32 %v60_v18, %v171_v29  ;;  %v3720_v41 = vand.u32 4294901760, %v2805_v31  ;;  %v49_v29 = vld [vmem:[#allocation5 + $0x48] sm:$0xff] }
  0x2f   :  { %v2819_v43 = vsub.f32 %v61_v19, %v174_v30  ;;  %v3718_v44 = vand.u32 4294901760, %v2807_v32  ;;  %v2822_v45 = vpack.c.bf16 %v126_v34, %v123_v33  ;;  %v2824_v46 = vsub.f32 %v44_v23, %v123_v33  ;;  %p2714_p6 = pnand %p2713_p5, %p2707_p2 }
  0x30   :  { %2278 = vmatpush3.bf16.msra.mxu0 %v2800_v27  ;;  %v338_v47 = vsub.f32 %v2805_v31, %v3720_v41  ;;  %v226_v48 = vsub.f32 %v2787_v15, %v3716_v35  ;;  %v233_v49 = vsub.f32 %v2791_v21, %v3715_v36  ;;  %v177_v50 = vand.u32 4294901760, %v62_v37  ;;  %v38_v41 = vld [vmem:[#allocation2] sm:$0xff] }
  0x31   :  { %2280 = vmatprep.subr.bf16.mxu0 %v2814_v39  ;;  %v345_v51 = vsub.f32 %v2807_v32, %v3718_v44  ;;  %v180_v52 = vand.u32 4294901760, %v63_v42  ;;  %v3713_v53 = vand.u32 4294901760, %v2796_v25  ;;  %v3711_v54 = vand.u32 4294901760, %v2798_v26 }
  0x32   :  { %v339_v57 = vand.u32 4294901760, %v338_v47  ;;  %v2842_v58 = vsub.f32 %v45_v24, %v126_v34  ;;  %v227_v59 = vand.u32 4294901760, %v226_v48  ;;  %v234_v60 = vand.u32 4294901760, %v233_v49 }
  0x33   :  { %v346_v61 = vand.u32 4294901760, %v345_v51  ;;  %v2844_v62 = vpack.c.bf16 %v180_v52, %v177_v50  ;;  %v2846_v63 = vsub.f32 %v62_v37, %v177_v50  ;;  %v352_v0 = vsub.f32 %v2796_v25, %v3713_v53 }
  0x34   :  { %2282 = vmatpush3.bf16.msra.mxu0 %v2822_v45  ;;  %v2305_v1 = vpack.c.bf16 %v234_v60, %v227_v59  ;;  %v359_v2 = vsub.f32 %v2798_v26, %v3711_v54  ;;  %v129_v3 = vand.u32 4294901760, %v46_v55  ;;  %v132_v4 = vand.u32 4294901760, %v47_v56  ;;  %v67_v59 = vld [vmem:[#allocation5 + $0xd8] sm:$0xff] }
  0x35   :  { %v2303_v7 = vpack.c.bf16 %v346_v61, %v339_v57  ;;  %2284 = vmatprep.subr.bf16.mxu0 %v2844_v62  ;;  %v353_v8 = vand.u32 4294901760, %v352_v0  ;;  %v3710_v9 = vand.u32 4294901760, %v2802_v28  ;;  %v3708_v10 = vand.u32 4294901760, %v2812_v38  ;;  %v66_v57 = vld [vmem:[#allocation5 + $0xd0] sm:$0xff]  ;;  %v71_v54 = vld [vmem:[#allocation5 + $0xf8] sm:$0xff] }
  0x36   :  { %v2858_v12 = vsub.f32 %v63_v42, %v180_v52  ;;  %v360_v13 = vand.u32 4294901760, %v359_v2  ;;  %v2860_v16 = vpack.c.bf16 %v132_v4, %v129_v3  ;;  %v2862_v17 = vsub.f32 %v46_v55, %v129_v3 }
  0x37   :  { %2304 = vmatprep.subr.bf16.mxu1 %v2303_v7  ;;  %v240_v18 = vsub.f32 %v2802_v28, %v3710_v9  ;;  %v247_v19 = vsub.f32 %v2812_v38, %v3708_v10  ;;  %v183_v23 = vand.u32 4294901760, %v64_v5  ;;  %v186_v24 = vand.u32 4294901760, %v65_v6  ;;  %v70_v9 = vld [vmem:[#allocation5 + $0xf0] sm:$0xff] }
  0x38   :  { %2306 = vmatpush3.bf16.msra.mxu1 %v2305_v1  ;;  %v2307_v30 = vpack.c.bf16 %v360_v13, %v353_v8  ;;  %2286 = vmatpush3.bf16.msra.mxu0 %v2860_v16  ;;  %v3706_v33 = vand.u32 4294901760, %v2816_v40  ;;  %v3705_v34 = vand.u32 4294901760, %v2819_v43  ;;  %v135_v37 = vand.u32 4294901760, %v48_v11  ;;  %v50_v1 = vld [vmem:[#allocation5 + $0x50] sm:$0xff] }
  0x39   :  { %v2873_v42 = vsub.f32 %v47_v56, %v132_v4  ;;  %v241_v47 = vand.u32 4294901760, %v240_v18  ;;  %v248_v48 = vand.u32 4294901760, %v247_v19  ;;  %v2875_v49 = vpack.c.bf16 %v186_v24, %v183_v23  ;;  %v51_v18 = vld [vmem:[#allocation5 + $0x58] sm:$0xff] }
  0x3a   :  { %2308 = vmatprep.subr.bf16.mxu1 %v2307_v30  ;;  %v2877_v50 = vsub.f32 %v64_v5, %v183_v23  ;;  %v366_v51 = vsub.f32 %v2816_v40, %v3706_v33  ;;  %v373_v52 = vsub.f32 %v2819_v43, %v3705_v34  ;;  %v138_v55 = vand.u32 4294901760, %v49_v29 }
  0x3b   :  { %v2309_v56 = vpack.c.bf16 %v248_v48, %v241_v47  ;;  %2288 = vmatprep.subr.bf16.mxu0 %v2875_v49  ;;  %v2886_v60 = vsub.f32 %v65_v6, %v186_v24  ;;  %v3703_v61 = vand.u32 4294901760, %v2824_v46  ;;  %v3701_v0 = vand.u32 4294901760, %v2842_v58 }
  0x3c   :  { %v367_v2 = vand.u32 4294901760, %v366_v51  ;;  %v374_v3 = vand.u32 4294901760, %v373_v52  ;;  %v2890_v4 = vpack.c.bf16 %v138_v55, %v135_v37  ;;  %v2892_v5 = vsub.f32 %v48_v11, %v135_v37 }
  0x3d   :  { %2310 = vmatpush3.bf16.msra.mxu1 %v2309_v56  ;;  %v254_v7 = vsub.f32 %v2824_v46, %v3703_v61  ;;  %v261_v6 = vsub.f32 %v2842_v58, %v3701_v0  ;;  %v189_v8 = vand.u32 4294901760, %v66_v57  ;;  %v192_v13 = vand.u32 4294901760, %v67_v59  ;;  %v69_v0 = vld [vmem:[#allocation5 + $0xe8] sm:$0xff] }
  0x3e   :  { %v2311_v19 = vpack.c.bf16 %v374_v3, %v367_v2  ;;  %2290 = vmatpush3.bf16.msra.mxu0 %v2890_v4  ;;  %v3702_v23 = vand.u32 4294901760, %v2846_v63  ;;  %v3704_v11 = vand.u32 4294901760, %v2858_v12  ;;  %v141_v24 = vand.u32 4294901760, %v50_v1  ;;  %v68_v3 = vld [vmem:[#allocation5 + $0xe0] sm:$0xff] }
  0x3f   :  { %v2903_v30 = vsub.f32 %v49_v29, %v138_v55  ;;  %v255_v37 = vand.u32 4294901760, %v254_v7  ;;  %v262_v47 = vand.u32 4294901760, %v261_v6  ;;  %v2905_v48 = vpack.c.bf16 %v192_v13, %v189_v8  ;;  %v52_v6 = vld [vmem:[#allocation5 + $0x60] sm:$0xff] }
  0x40   :  { %2312 = vmatprep.subr.bf16.mxu1 %v2311_v19  ;;  %v2907_v51 = vsub.f32 %v66_v57, %v189_v8  ;;  %v380_v52 = vsub.f32 %v2846_v63, %v3702_v23  ;;  %v387_v56 = vsub.f32 %v2858_v12, %v3704_v11  ;;  %v144_v2 = vand.u32 4294901760, %v51_v18  ;;  %v53_v11 = vld [vmem:[#allocation5 + $0x68] sm:$0xff] }
  0x41   :  { %v2313_v29 = vpack.c.bf16 %v262_v47, %v255_v37  ;;  %2292 = vmatprep.subr.bf16.mxu0 %v2905_v48  ;;  %v2916_v55 = vsub.f32 %v67_v59, %v192_v13  ;;  %v3707_v7 = vand.u32 4294901760, %v2862_v17  ;;  %v3709_v57 = vand.u32 4294901760, %v2873_v42 }
  0x42   :  { %v381_v8 = vand.u32 4294901760, %v380_v52  ;;  %v388_v19 = vand.u32 4294901760, %v387_v56  ;;  %v2920_v23 = vpack.c.bf16 %v144_v2, %v141_v24  ;;  %v2922_v61 = vsub.f32 %v50_v1, %v141_v24 }
  0x43   :  { %2314 = vmatpush3.bf16.msra.mxu1 %v2313_v29  ;;  %v268_v37 = vsub.f32 %v2862_v17, %v3707_v7  ;;  %v275_v59 = vsub.f32 %v2873_v42, %v3709_v57  ;;  %v195_v13 = vand.u32 4294901760, %v68_v3  ;;  %v198_v47 = vand.u32 4294901760, %v69_v0 }
  0x44   :  { %v2315_v34 = vpack.c.bf16 %v388_v19, %v381_v8  ;;  %2294 = vmatpush3.bf16.msra.mxu0 %v2920_v23  ;;  %v3712_v52 = vand.u32 4294901760, %v2877_v50  ;;  %v3714_v1 = vand.u32 4294901760, %v2886_v60  ;;  %v147_v24 = vand.u32 4294901760, %v52_v6 }
  0x45   :  { %v2933_v56 = vsub.f32 %v51_v18, %v144_v2  ;;  %v269_v29 = vand.u32 4294901760, %v268_v37  ;;  %v276_v33 = vand.u32 4294901760, %v275_v59  ;;  %v2935_v7 = vpack.c.bf16 %v198_v47, %v195_v13  ;;  %v54_v37 = vld [vmem:[#allocation5 + $0x70] sm:$0xff] }
  0x46   :  { %2316 = vmatprep.subr.bf16.mxu1 %v2315_v34  ;;  %v2937_v10 = vsub.f32 %v68_v3, %v195_v13  ;;  %v394_v8 = vsub.f32 %v2877_v50, %v3712_v52  ;;  %v401_v19 = vsub.f32 %v2886_v60, %v3714_v1  ;;  %v150_v57 = vand.u32 4294901760, %v53_v11  ;;  %v55_v1 = vld [vmem:[#allocation5 + $0x78] sm:$0xff] }
  0x47   :  { %3789 = vst [vmem:[#allocation11_spill] sm:$0xff] %v2935_v7  ;;  %v2317_v18 = vpack.c.bf16 %v276_v33, %v269_v29  ;;  %2296 = vmatprep.subr.bf16.mxu0 %v2935_v7  ;;  %v2946_v2 = vsub.f32 %v69_v0, %v198_v47  ;;  %v3717_v34 = vand.u32 4294901760, %v2892_v5  ;;  %v3719_v3 = vand.u32 4294901760, %v2903_v30 }
  0x48   :  { %v395_v59 = vand.u32 4294901760, %v394_v8  ;;  %v402_v13 = vand.u32 4294901760, %v401_v19  ;;  %v2950_v52 = vpack.c.bf16 %v150_v57, %v147_v24  ;;  %v2952_v53 = vsub.f32 %v52_v6, %v147_v24 }
  0x49   :  { %2318 = vmatpush3.bf16.msra.mxu1 %v2317_v18  ;;  %v282_v33 = vsub.f32 %v2892_v5, %v3717_v34  ;;  %v289_v0 = vsub.f32 %v2903_v30, %v3719_v3  ;;  %v201_v47 = vand.u32 4294901760, %v70_v9  ;;  %v204_v29 = vand.u32 4294901760, %v71_v54 }
  0x4a   :  { %3790 = vst [vmem:[#allocation12_spill] sm:$0xff] %v2950_v52  ;;  %v2319_v36 = vpack.c.bf16 %v402_v13, %v395_v59  ;;  %2298 = vmatpush3.bf16.msra.mxu0 %v2950_v52  ;;  %v3725_v8 = vand.u32 4294901760, %v2907_v51  ;;  %v3723_v6 = vand.u32 4294901760, %v2916_v55  ;;  %v153_v24 = vand.u32 4294901760, %v54_v37 }
  0x4b   :  { %v2963_v19 = vsub.f32 %v53_v11, %v150_v57  ;;  %v283_v18 = vand.u32 4294901760, %v282_v33  ;;  %v290_v35 = vand.u32 4294901760, %v289_v0  ;;  %v2965_v34 = vpack.c.bf16 %v204_v29, %v201_v47 }
  0x4c   :  { %2320 = vmatprep.subr.bf16.mxu1 %v2319_v36  ;;  %v2967_v44 = vsub.f32 %v70_v9, %v201_v47  ;;  %v408_v59 = vsub.f32 %v2907_v51, %v3725_v8  ;;  %v415_v13 = vsub.f32 %v2916_v55, %v3723_v6  ;;  %v156_v3 = vand.u32 4294901760, %v55_v1 }
  0x4d   :  { %3791 = vst [vmem:[#allocation13_spill] sm:$0xff] %v2965_v34  ;;  %v2321_v52 = vpack.c.bf16 %v290_v35, %v283_v18  ;;  %2300 = vmatprep.subr.bf16.mxu0 %v2965_v34  ;;  %v2976_v11 = vsub.f32 %v71_v54, %v204_v29  ;;  %v3724_v57 = vand.u32 4294901760, %v2922_v61  ;;  %v3726_v36 = vand.u32 4294901760, %v2933_v56 }
  0x4e   :  { %v409_v9 = vand.u32 4294901760, %v408_v59  ;;  %v416_v33 = vand.u32 4294901760, %v415_v13  ;;  %v2980_v0 = vpack.c.bf16 %v156_v3, %v153_v24  ;;  %v2982_v47 = vsub.f32 %v54_v37, %v153_v24 }
  0x4f   :  { %2322 = vmatpush3.bf16.msra.mxu1 %v2321_v52  ;;  %v296_v6 = vsub.f32 %v2922_v61, %v3724_v57  ;;  %v303_v35 = vsub.f32 %v2933_v56, %v3726_v36  ;;  %v106_v54 = vcombine.high %v38_v41, %v38_v41  ;;  %v2990_v29 = vand.u32 4294901760, %v38_v41 }
  0x50   :  { %3792 = vst [vmem:[#allocation14_spill] sm:$0xff] %v2980_v0  ;;  %v2323_v18 = vpack.c.bf16 %v416_v33, %v409_v9  ;;  %2302 = vmatpush3.bf16.msra.mxu0 %v2980_v0  ;;  %v3729_v59 = vand.u32 4294901760, %v2937_v10  ;;  %v3732_v37 = vand.u32 4294901760, %v2946_v2  ;;  %v2335_v52 = vpack.c.bf16 %v2807_v32, %v2805_v31 }
  0x51   :  { %v297_v24 = vand.u32 4294901760, %v296_v6  ;;  %v304_v13 = vand.u32 4294901760, %v303_v35  ;;  %v2997_v57 = vand.u32 4294901760, %v106_v54  ;;  %v3000_v8 = vsub.f32 %v38_v41, %v2990_v29 }
  0x52   :  { %2324 = vmatprep.subr.bf16.mxu1 %v2323_v18  ;;  %v422_v9 = vsub.f32 %v2937_v10, %v3729_v59  ;;  %v429_v33 = vsub.f32 %v2946_v2, %v3732_v37  ;;  %2336 = vmatprep.subr.bf16.mxu0 %v2335_v52  ;;  %v3733_v36 = vand.u32 4294901760, %v2952_v53  ;;  %v3734_v6 = vand.u32 4294901760, %v2963_v19 }
  0x53   :  { %3793 = vst [vmem:[#allocation15_spill] sm:$0xff] %v2997_v57  ;;  %3794 = vst [vmem:[#allocation16_spill] sm:$0xff] %v3000_v8  ;;  %v3010_v35 = vsub.f32 %v55_v1, %v156_v3  ;;  %v2325_v0 = vpack.c.bf16 %v304_v13, %v297_v24  ;;  %v3013_v41 = vsub.f32 %v106_v54, %v2997_v57  ;;  %v3737_v18 = vand.u32 4294901760, %v3000_v8 }
  0x54   :  { %447 = vmatprep.mubr.f32.mxu1 %v2997_v57  ;;  %v423_v59 = vand.u32 4294901760, %v422_v9  ;;  %v430_v34 = vand.u32 4294901760, %v429_v33  ;;  %v310_v52 = vsub.f32 %v2952_v53, %v3733_v36  ;;  %v317_v37 = vsub.f32 %v2963_v19, %v3734_v6 }
  0x55   :  { %2326 = vmatpush3.bf16.msra.mxu1 %v2325_v0  ;;  %v208_v1 = vand.u32 4294901760, %v3013_v41  ;;  %v215_v3 = vsub.f32 %v3000_v8, %v3737_v18  ;;  %v3742_v54 = vand.u32 4294901760, %v2967_v44  ;;  %v442_v24 = vand.u32 4294901760, %v2976_v11 }
  0x56   :  { %v2327_v13 = vpack.c.bf16 %v430_v34, %v423_v59  ;;  %v311_v9 = vand.u32 4294901760, %v310_v52  ;;  %v318_v33 = vand.u32 4294901760, %v317_v37  ;;  %v3743_v8 = vand.u32 4294901760, %v2982_v47 }
  0x57   :  { %v209_v36 = vsub.f32 %v3013_v41, %v208_v1  ;;  %v436_v6 = vsub.f32 %v2967_v44, %v3742_v54  ;;  %v443_v0 = vsub.f32 %v2976_v11, %v442_v24  ;;  %v216_v57 = vand.u32 4294901760, %v215_v3 }
  0x58   :  { %2328 = vmatprep.subr.bf16.mxu1 %v2327_v13  ;;  %v2329_v18 = vpack.c.bf16 %v318_v33, %v311_v9  ;;  %v330_v7 = vand.u32 4294901760, %v3010_v35  ;;  %v2337_v59 = vpack.c.bf16 %v2791_v21, %v2787_v15  ;;  %v2339_v54 = vpack.c.bf16 %v2798_v26, %v2796_v25 }
  0x59   :  { %v210_v34 = vand.u32 4294901760, %v209_v36  ;;  %v437_v37 = vand.u32 4294901760, %v436_v6  ;;  %v444_v52 = vand.u32 4294901760, %v443_v0  ;;  %v324_v13 = vsub.f32 %v2982_v47, %v3743_v8 }
  0x5a   :  { %2330 = vmatpush3.bf16.msra.mxu1 %v2329_v18  ;;  %v331_v3 = vsub.f32 %v3010_v35, %v330_v7  ;;  %v2341_v6 = vpack.c.bf16 %v2812_v38, %v2802_v28  ;;  %v2343_v18 = vpack.c.bf16 %v2819_v43, %v2816_v40  ;;  %v2345_v8 = vpack.c.bf16 %v2842_v58, %v2824_v46 }
  0x5b   :  { %211 = vmatprep.mubr.f32.mxu0 %v210_v34  ;;  %v2331_v9 = vpack.c.bf16 %v444_v52, %v437_v37  ;;  %v325_v36 = vand.u32 4294901760, %v324_v13  ;;  %v3795_v34 = vand.u32 4294901760, %v2805_v31  ;;  %v3798_v52 = vand.u32 4294901760, %v2791_v21 }
  0x5c   :  { %217 = vmatmul.mubr.f32.vlgmr.msra.gmra.mrb[0].mxu0 %v216_v57  ;;  %v332_v33 = vand.u32 4294901760, %v331_v3  ;;  %v3796_v57 = vand.u32 4294901760, %v2807_v32  ;;  %v3799_v3 = vand.u32 4294901760, %v2796_v25  ;;  %v3803_v31 = vand.u32 4294901760, %v2816_v40 }
  0x5d   :  { %2338 = vmatpush3.bf16.msra.mxu0 %v2337_v59  ;;  %2332 = vmatprep.subr.bf16.mxu1 %v2331_v9  ;;  %v3797_v59 = vand.u32 4294901760, %v2787_v15  ;;  %v3804_v32 = vand.u32 4294901760, %v2819_v43  ;;  %v3805_v15 = vand.u32 4294901760, %v2824_v46  ;;  %v3806_v21 = vand.u32 4294901760, %v2842_v58 }
  0x5e   :  { %2340 = vmatprep.subr.bf16.mxu0 %v2339_v54  ;;  %v2333_v0 = vpack.c.bf16 %v332_v33, %v325_v36  ;;  %584 = vmatprep.mubr.f32.mxu0 %v3013_v41  ;;  %v2399_v37 = vpack.c.bf16 %v3796_v57, %v3795_v34  ;;  %v3800_v54 = vand.u32 4294901760, %v2798_v26  ;;  %v3801_v36 = vand.u32 4294901760, %v2802_v28 }
  0x5f   :  { %v2401_v13 = vpack.c.bf16 %v3798_v52, %v3797_v59  ;;  %v3802_v33 = vand.u32 4294901760, %v2812_v38  ;;  %v3077_v34 = vpack.c.bf16 %v3804_v32, %v3803_v31  ;;  %v3083_v25 = vpack.c.bf16 %v3806_v21, %v3805_v15 }
  0x60   :  { %v2403_v9 = vpack.c.bf16 %v3800_v54, %v3799_v3  ;;  %2334 = vmatpush3.bf16.msra.mxu1 %v2333_v0  ;;  %v3807_v26 = vand.u32 4294901760, %v2846_v63  ;;  %v3808_v28 = vand.u32 4294901760, %v2858_v12  ;;  %v3809_v57 = vand.u32 4294901760, %v2862_v17 }
  0x61   :  { %v3071_v41 = vpack.c.bf16 %v3802_v33, %v3801_v36  ;;  %v3810_v40 = vand.u32 4294901760, %v2873_v42  ;;  %v3811_v0 = vand.u32 4294901760, %v2877_v50  ;;  %v3812_v46 = vand.u32 4294901760, %v2886_v60  ;;  %2342 = vmatpush3.bf16.msra.mxu0 %v2341_v6  ;;  %2368 = vmatprep.subr.bf16.mxu1 %v2785_v14 }
  0x62   :  { %v3089_v38 = vpack.c.bf16 %v3808_v28, %v3807_v26  ;;  %v3813_v58 = vand.u32 4294901760, %v2892_v5  ;;  %v3814_v52 = vand.u32 4294901760, %v2903_v30  ;;  %v3815_v54 = vand.u32 4294901760, %v2907_v51  ;;  %2344 = vmatprep.subr.bf16.mxu0 %v2343_v18 }
  0x63   :  { %v3095_v43 = vpack.c.bf16 %v3810_v40, %v3809_v57  ;;  %v3101_v59 = vpack.c.bf16 %v3812_v46, %v3811_v0  ;;  %v3816_v36 = vand.u32 4294901760, %v2916_v55  ;;  %v3817_v31 = vand.u32 4294901760, %v2922_v61  ;;  %449 = vmatmul.mubr.f32.vlgmr.msra.gmra.mrb[0].mxu1 %v2990_v29  ;;  %v3825_v0 = vld [vmem:[#allocation15_spill] sm:$0xff] }
  0x64   :  { %v3108_v3 = vpack.c.bf16 %v3814_v52, %v3813_v58  ;;  %v3818_v32 = vand.u32 4294901760, %v2933_v56  ;;  %v2347_v6 = vpack.c.bf16 %v2858_v12, %v2846_v63  ;;  %v3819_v21 = vand.u32 4294901760, %v2952_v53  ;;  %2370 = vmatpush3.bf16.msra.mxu1 %v2789_v20  ;;  %691 = vmatprep.mubr.f32.mxu1 %v208_v1  ;;  %v3824_v1 = vld [vmem:[#allocation13_spill] sm:$0xff]  ;;  %v3826_v52 = vld [vmem:[#allocation14_spill] sm:$0xff] }
  0x65   :  { %v3114_v33 = vpack.c.bf16 %v3816_v36, %v3815_v54  ;;  %v3820_v26 = vand.u32 4294901760, %v2963_v19  ;;  %2346 = vmatpush3.bf16.msra.mxu0 %v2345_v8  ;;  %2372 = vmatprep.subr.bf16.mxu1 %v2793_v22  ;;  %v2349_v18 = vpack.c.bf16 %v2873_v42, %v2862_v17  ;;  %v2351_v63 = vpack.c.bf16 %v2886_v60, %v2877_v50 }
  0x66   :  { %v3120_v15 = vpack.c.bf16 %v3818_v32, %v3817_v31  ;;  %2348 = vmatprep.subr.bf16.mxu0 %v2347_v6  ;;  %v2353_v12 = vpack.c.bf16 %v2903_v30, %v2892_v5  ;;  %v2355_v8 = vpack.c.bf16 %v2916_v55, %v2907_v51  ;;  %v2357_v17 = vpack.c.bf16 %v2933_v56, %v2922_v61  ;;  %v3821_v5 = vld [vmem:[#allocation11_spill] sm:$0xff]  ;;  %v3822_v51 = vld [vmem:[#allocation16_spill] sm:$0xff] }
  0x67   :  { %v3128_v28 = vpack.c.bf16 %v3820_v26, %v3819_v21  ;;  %v2359_v42 = vpack.c.bf16 %v2946_v2, %v2937_v10  ;;  %v2361_v50 = vpack.c.bf16 %v2963_v19, %v2952_v53  ;;  %v2363_v60 = vpack.c.bf16 %v2976_v11, %v2967_v44  ;;  %v88_v53 = vld [vmem:[#allocation5 + $0x180] sm:$0xff]  ;;  %v89_v30 = vld [vmem:[#allocation5 + $0x188] sm:$0xff]  ;;  %v74_v21 = vld [vmem:[#allocation5 + $0x110] sm:$0xff] }
  0x68   :  { %2374 = vmatpush3.bf16.msra.mxu1 %v2800_v27  ;;  %v2365_v61 = vpack.c.bf16 %v3010_v35, %v2982_v47  ;;  %v3823_v55 = vld [vmem:[#allocation12_spill] sm:$0xff]  ;;  %v72_v56 = vld [vmem:[#allocation5 + $0x100] sm:$0xff]  ;;  %v1021_v57 = vand.u32 4294901760, %v88_v53  ;;  %v1024_v40 = vand.u32 4294901760, %v89_v30  ;;  %v75_v26 = vld [vmem:[#allocation5 + $0x118] sm:$0xff]  ;;  %v979_v11 = vand.u32 4294901760, %v74_v21 }
  0x69   :  { %2350 = vmatpush3.bf16.msra.mxu0 %v2349_v18  ;;  %2376 = vmatprep.subr.bf16.mxu1 %v2814_v39  ;;  %v73_v19 = vld [vmem:[#allocation5 + $0x108] sm:$0xff]  ;;  %v973_v46 = vand.u32 4294901760, %v72_v56 }
  0x6a   :  { %2352 = vmatprep.subr.bf16.mxu0 %v2351_v63  ;;  %v976_v58 = vand.u32 4294901760, %v73_v19  ;;  %v3168_v54 = vsub.f32 %v88_v53, %v1021_v57  ;;  %v3170_v36 = vsub.f32 %v89_v30, %v1024_v40 }
  0x6b   :  { %v3175_v31 = vsub.f32 %v72_v56, %v973_v46 }
  0x6c   :  { %2378 = vmatpush3.bf16.msra.mxu1 %v2822_v45  ;;  %v3177_v32 = vsub.f32 %v73_v19, %v976_v58 }
  0x6d   :  { %2354 = vmatpush3.bf16.msra.mxu0 %v2353_v12  ;;  %2380 = vmatprep.subr.bf16.mxu1 %v2844_v62  ;;  %v3830_v12 = vand.u32 4294901760, %v2967_v44  ;;  %v3208_v44 = vpack.c.bf16 %v976_v58, %v973_v46  ;;  %v3232_v46 = vsub.f32 %v74_v21, %v979_v11 }
  0x6e   :  { %2356 = vmatprep.subr.bf16.mxu0 %v2355_v8 }
  0x6f   :  { %v3193_v8 = vpack.c.bf16 %v442_v24, %v3830_v12  ;;  %3832 = vst [vmem:[#allocation11_spill] sm:$0xff] %v3208_v44  ;;  %v982_v24 = vand.u32 4294901760, %v75_v26 }
  0x70   :  { %2382 = vmatpush3.bf16.msra.mxu1 %v2860_v16 }
  0x71   :  { %2358 = vmatpush3.bf16.msra.mxu0 %v2357_v17  ;;  %2384 = vmatprep.subr.bf16.mxu1 %v2875_v49  ;;  %v3753_v17 = vand.u32 4294901760, %v3168_v54 }
  0x72   :  { %2360 = vmatprep.subr.bf16.mxu0 %v2359_v42  ;;  %v3751_v42 = vand.u32 4294901760, %v3170_v36 }
  0x73   :  { %v1200_v56 = vsub.f32 %v3168_v54, %v3753_v17 }
  0x74   :  { %2386 = vmatpush3.bf16.msra.mxu1 %v2890_v4 }
  0x75   :  { %2362 = vmatpush3.bf16.msra.mxu0 %v2361_v50  ;;  %2388 = vmatprep.subr.bf16.mxu1 %v2905_v48  ;;  %v77_v50 = vld [vmem:[#allocation5 + $0x128] sm:$0xff] }
  0x76   :  { %2364 = vmatprep.subr.bf16.mxu0 %v2363_v60  ;;  %v3749_v60 = vand.u32 4294901760, %v3175_v31 }
  0x78   :  { %2390 = vmatpush3.bf16.msra.mxu1 %v2920_v23 }
  0x79   :  { %2366 = vmatpush3.bf16.msra.mxu0 %v2365_v61  ;;  %2392 = vmatprep.subr.bf16.mxu1 %v3821_v5  ;;  %v3747_v61 = vand.u32 4294901760, %v3177_v32 }
  0x7a   :  { %2400 = vmatprep.subr.bf16.mxu0 %v2399_v37  ;;  %v90_v37 = vld [vmem:[#allocation5 + $0x190] sm:$0xff] }
  0x7b   :  { %v1027_v6 = vand.u32 4294901760, %v90_v37 }
  0x7c   :  { %587 = vmatmul.mubr.f32.vlgmr.msra.gmra.mrb[2].mxu0 %v3822_v51  ;;  %2394 = vmatpush3.bf16.msra.mxu1 %v3823_v55 }
  0x7d   :  { %2402 = vmatpush3.bf16.msra.mxu0 %v2401_v13  ;;  %2396 = vmatprep.subr.bf16.mxu1 %v3824_v1  ;;  %v91_v13 = vld [vmem:[#allocation5 + $0x198] sm:$0xff]  ;;  %v3210_v35 = vsub.f32 %v90_v37, %v1027_v6 }
  0x7e   :  { %2404 = vmatprep.subr.bf16.mxu0 %v2403_v9  ;;  %861 = vmatprep.mubr.f32.mxu0 %v3825_v0  ;;  %v3827_v9 = vand.u32 4294901760, %v3822_v51  ;;  %v1030_v63 = vand.u32 4294901760, %v91_v13 }
  0x80   :  { %2398 = vmatpush3.bf16.msra.mxu1 %v3826_v52  ;;  %v3215_v53 = vpack.c.bf16 %v1030_v63, %v1027_v6 }
  0x81   :  { %2406 = vmatpush3.bf16.msra.mxu0 %v3071_v41  ;;  %2432 = vmatprep.subr.bf16.mxu1 %v2785_v14  ;;  %v3828_v14 = vand.u32 4294901760, %v2937_v10  ;;  %v3829_v41 = vand.u32 4294901760, %v2946_v2  ;;  %v93_v2 = vld [vmem:[#allocation5 + $0x1a8] sm:$0xff] }
  0x82   :  { %2408 = vmatprep.subr.bf16.mxu0 %v3077_v34  ;;  %v92_v34 = vld [vmem:[#allocation5 + $0x1a0] sm:$0xff]  ;;  %v1036_v30 = vand.u32 4294901760, %v93_v2 }
  0x83   :  { %695 = vmatmul.mubr.f32.vlgmr.msra.gmra.mrb[2].mxu1 %v3827_v9  ;;  %v3184_v18 = vpack.c.bf16 %v3829_v41, %v3828_v14  ;;  %v1095_v9 = vsub.f32 %v3177_v32, %v3747_v61  ;;  %v1201_v41 = vand.u32 4294901760, %v1200_v56  ;;  %v81_v61 = vld [vmem:[#allocation5 + $0x148] sm:$0xff] }
  0x84   :  { %2434 = vmatpush3.bf16.msra.mxu1 %v2789_v20  ;;  %965 = vmatprep.mubr.f32.mxu1 %v3825_v0  ;;  %v3831_v20 = vand.u32 4294901760, %v2982_v47  ;;  %v76_v47 = vld [vmem:[#allocation5 + $0x120] sm:$0xff]  ;;  %v3230_v0 = vpack.c.bf16 %v982_v24, %v979_v11  ;;  %v3250_v21 = vsub.f32 %v93_v2, %v1036_v30  ;;  %v79_v11 = vld [vmem:[#allocation5 + $0x138] sm:$0xff] }
  0x85   :  { %2410 = vmatpush3.bf16.msra.mxu0 %v3083_v25  ;;  %2436 = vmatprep.subr.bf16.mxu1 %v2793_v22  ;;  %v3203_v25 = vld [vmem:[#allocation2 + $0x8] sm:$0xff]  ;;  %v3206_v22 = vpack.c.bf16 %v1024_v40, %v1021_v57  ;;  %v985_v19 = vand.u32 4294901760, %v76_v47  ;;  %v988_v57 = vand.u32 4294901760, %v77_v50  ;;  %v94_v40 = vld [vmem:[#allocation5 + $0x1b0] sm:$0xff] }
  0x86   :  { %v3199_v10 = vpack.c.bf16 %v330_v7, %v3831_v20  ;;  %2412 = vmatprep.subr.bf16.mxu0 %v3089_v38  ;;  %v1033_v7 = vand.u32 4294901760, %v92_v34  ;;  %v3217_v38 = vsub.f32 %v91_v13, %v1030_v63  ;;  %v107_v51 = vcombine.high %v3203_v25, %v3203_v25  ;;  %3833 = vst [vmem:[#allocation16_spill] sm:$0xff] %v3230_v0  ;;  %v78_v20 = vld [vmem:[#allocation5 + $0x130] sm:$0xff] }
  0x87   :  { %v1088_v13 = vsub.f32 %v3175_v31, %v3749_v60  ;;  %v3260_v2 = vsub.f32 %v77_v50, %v988_v57  ;;  %v991_v50 = vand.u32 4294901760, %v78_v20 }
  0x88   :  { %2438 = vmatpush3.bf16.msra.mxu1 %v2800_v27  ;;  %v1207_v27 = vsub.f32 %v3170_v36, %v3751_v42  ;;  %v3236_v58 = vand.u32 4294901760, %v107_v51  ;;  %v3238_v37 = vsub.f32 %v92_v34, %v1033_v7  ;;  %v3248_v6 = vpack.c.bf16 %v1036_v30, %v1033_v7 }
  0x89   :  { %2414 = vmatpush3.bf16.msra.mxu0 %v3095_v43  ;;  %2440 = vmatprep.subr.bf16.mxu1 %v2814_v39  ;;  %v3234_v43 = vsub.f32 %v75_v26, %v982_v24  ;;  %v95_v39 = vld [vmem:[#allocation5 + $0x1b8] sm:$0xff]  ;;  %v1039_v26 = vand.u32 4294901760, %v94_v40  ;;  %v3744_v14 = vand.u32 4294901760, %v3217_v38  ;;  %v3255_v34 = vpack.c.bf16 %v988_v57, %v985_v19 }
  0x8a   :  { %2416 = vmatprep.subr.bf16.mxu0 %v3101_v59  ;;  %3834 = vst [vmem:[#allocation12_spill] sm:$0xff] %v3236_v58  ;;  %v3746_v59 = vand.u32 4294901760, %v3210_v35  ;;  %3835 = vst [vmem:[#allocation13_spill] sm:$0xff] %v3248_v6  ;;  %v1208_v63 = vand.u32 4294901760, %v1207_v27  ;;  %v1042_v12 = vand.u32 4294901760, %v95_v39  ;;  %v3745_v24 = vand.u32 4294901760, %v3232_v46 }
  0x8b   :  { %3836 = vst [vmem:[#allocation15_spill] sm:$0xff] %v3255_v34  ;;  %v3264_v7 = vsub.f32 %v107_v51, %v3236_v58  ;;  %v3748_v56 = vand.u32 4294901760, %v3234_v43  ;;  %v994_v27 = vand.u32 4294901760, %v79_v11  ;;  %v96_v51 = vld [vmem:[#allocation5 + $0x1c0] sm:$0xff] }
  0x8c   :  { %2442 = vmatpush3.bf16.msra.mxu1 %v2822_v45  ;;  %v3258_v45 = vsub.f32 %v76_v47, %v985_v19  ;;  %v1214_v30 = vsub.f32 %v3210_v35, %v3746_v59  ;;  %v1221_v47 = vsub.f32 %v3217_v38, %v3744_v14  ;;  %v3278_v19 = vpack.c.bf16 %v1208_v63, %v1201_v41 }
  0x8d   :  { %2418 = vmatpush3.bf16.msra.mxu0 %v3108_v3  ;;  %2444 = vmatprep.subr.bf16.mxu1 %v2844_v62  ;;  %v1089_v3 = vand.u32 4294901760, %v1088_v13  ;;  %v1096_v62 = vand.u32 4294901760, %v1095_v9  ;;  %v3280_v57 = vpack.c.bf16 %v1042_v12, %v1039_v26  ;;  %v3282_v13 = vsub.f32 %v95_v39, %v1042_v12 }
  0x8e   :  { %2420 = vmatprep.subr.bf16.mxu0 %v3114_v33  ;;  %v3271_v33 = vsub.f32 %v94_v40, %v1039_v26  ;;  %v1102_v40 = vsub.f32 %v3232_v46, %v3745_v24  ;;  %v3750_v9 = vand.u32 4294901760, %v3238_v37  ;;  %v3752_v14 = vand.u32 4294901760, %v3250_v21 }
  0x8f   :  { %3837 = vst [vmem:[#allocation14_spill] sm:$0xff] %v3280_v57  ;;  %3838 = vst [vmem:[#allocation17_spill] sm:$0xff] %v3282_v13  ;;  %v3291_v41 = vpack.c.bf16 %v1096_v62, %v1089_v3  ;;  %v1215_v26 = vand.u32 4294901760, %v1214_v30  ;;  %v1109_v39 = vsub.f32 %v3234_v43, %v3748_v56  ;;  %v1045_v63 = vand.u32 4294901760, %v96_v51 }
  0x90   :  { %2446 = vmatpush3.bf16.msra.mxu1 %v2860_v16  ;;  %v97_v16 = vld [vmem:[#allocation5 + $0x1c8] sm:$0xff]  ;;  %v3297_v12 = vpack.c.bf16 %v994_v27, %v991_v50  ;;  %v3299_v24 = vsub.f32 %v78_v20, %v991_v50  ;;  %v3303_v3 = vsub.f32 %v79_v11, %v994_v27  ;;  %v3754_v30 = vand.u32 4294901760, %v3258_v45  ;;  %v99_v27 = vld [vmem:[#allocation5 + $0x1d8] sm:$0xff] }
  0x91   :  { %2422 = vmatpush3.bf16.msra.mxu0 %v3120_v15  ;;  %2448 = vmatprep.subr.bf16.mxu1 %v2875_v49  ;;  %v80_v15 = vld [vmem:[#allocation5 + $0x140] sm:$0xff]  ;;  %v3758_v49 = vand.u32 4294901760, %v3264_v7  ;;  %v1048_v59 = vand.u32 4294901760, %v97_v16  ;;  %v3755_v56 = vand.u32 4294901760, %v3260_v2  ;;  %v1228_v20 = vsub.f32 %v3238_v37, %v3750_v9 }
  0x92   :  { %2424 = vmatprep.subr.bf16.mxu0 %v3184_v18  ;;  %v1222_v18 = vand.u32 4294901760, %v1221_v47  ;;  %3839 = vst [vmem:[#allocation18_spill] sm:$0xff] %v3297_v12  ;;  %v997_v62 = vand.u32 4294901760, %v80_v15  ;;  %v98_v47 = vld [vmem:[#allocation5 + $0x1d0] sm:$0xff]  ;;  %v1110_v11 = vand.u32 4294901760, %v1109_v39  ;;  %v1000_v50 = vand.u32 4294901760, %v81_v61 }
  0x93   :  { %v3756_v60 = vand.u32 4294901760, %v3271_v33  ;;  %v3322_v9 = vpack.c.bf16 %v1048_v59, %v1045_v63  ;;  %v3324_v42 = vsub.f32 %v96_v51, %v1045_v63  ;;  %v1116_v17 = vsub.f32 %v3258_v45, %v3754_v30 }
  0x94   :  { %2450 = vmatpush3.bf16.msra.mxu1 %v2890_v4  ;;  %v1103_v4 = vand.u32 4294901760, %v1102_v40  ;;  %v3320_v40 = vpack.c.bf16 %v1222_v18, %v1215_v26  ;;  %v3330_v39 = vsub.f32 %v80_v15, %v997_v62  ;;  %v1051_v26 = vand.u32 4294901760, %v98_v47  ;;  %v82_v18 = vld [vmem:[#allocation5 + $0x150] sm:$0xff] }
  0x95   :  { %2426 = vmatpush3.bf16.msra.mxu0 %v3128_v28  ;;  %2452 = vmatprep.subr.bf16.mxu1 %v2905_v48  ;;  %v1235_v28 = vsub.f32 %v3250_v21, %v3752_v14  ;;  %v1071_v48 = vsub.f32 %v3264_v7, %v3758_v49  ;;  %v3326_v14 = vsub.f32 %v97_v16, %v1048_v59  ;;  %v1229_v59 = vand.u32 4294901760, %v1228_v20  ;;  %v3359_v49 = vld [vmem:[#allocation5 + $0x1e8] sm:$0xff] }
  0x96   :  { %2428 = vmatprep.subr.bf16.mxu0 %v3193_v8  ;;  %v3757_v8 = vand.u32 4294901760, %v3282_v13  ;;  %3840 = vst [vmem:[#allocation19_spill] sm:$0xff] %v3330_v39  ;;  %v1054_v16 = vand.u32 4294901760, %v99_v27  ;;  %v3341_v15 = vpack.c.bf16 %v1000_v50, %v997_v62  ;;  %v1242_v30 = vsub.f32 %v3271_v33, %v3756_v60 }
  0x97   :  { %v1236_v51 = vand.u32 4294901760, %v1235_v28  ;;  %v1072_v63 = vand.u32 4294901760, %v1071_v48  ;;  %v3351_v20 = vsub.f32 %v81_v61, %v1000_v50  ;;  %v1003_v28 = vand.u32 4294901760, %v82_v18  ;;  %v3355_v48 = vld [vmem:[#allocation5 + $0x1e0] sm:$0xff] }
  0x98   :  { %2454 = vmatpush3.bf16.msra.mxu1 %v2920_v23  ;;  %v1123_v23 = vsub.f32 %v3260_v2, %v3755_v56  ;;  %3841 = vst [vmem:[#allocation20_spill] sm:$0xff] %v3341_v15  ;;  %v1249_v56 = vsub.f32 %v3282_v13, %v3757_v8  ;;  %v3363_v50 = vpack.c.bf16 %v1054_v16, %v1051_v26  ;;  %v3763_v62 = vand.u32 4294901760, %v3326_v14  ;;  %v3368_v13 = vld [vmem:[#allocation5 + $0x160] sm:$0xff] }
  0x99   :  { %2430 = vmatpush3.bf16.msra.mxu0 %v3199_v10  ;;  %2456 = vmatprep.subr.bf16.mxu1 %v3821_v5  ;;  %v83_v10 = vld [vmem:[#allocation5 + $0x158] sm:$0xff]  ;;  %v3339_v5 = vpack.c.bf16 %v1110_v11, %v1103_v4  ;;  %3842 = vst [vmem:[#allocation21_spill] sm:$0xff] %v3351_v20  ;;  %v1117_v11 = vand.u32 4294901760, %v1116_v17  ;;  %v2503_v61 = vpack.c.bf16 %v1236_v51, %v1229_v59  ;;  %v1243_v17 = vand.u32 4294901760, %v1242_v30 }
  0x9a   :  { %2464 = vmatprep.subr.bf16.mxu0 %v3206_v22  ;;  %v1124_v60 = vand.u32 4294901760, %v1123_v23  ;;  %v1006_v8 = vand.u32 4294901760, %v83_v10  ;;  %3843 = vst [vmem:[#allocation22_spill] sm:$0xff] %v3363_v50  ;;  %v3365_v4 = vsub.f32 %v98_v47, %v1051_v26  ;;  %v1250_v23 = vand.u32 4294901760, %v1249_v56 }
  0x9b   :  { %v3846_v59 = vand.u32 4294901760, %v3299_v24  ;;  %v3847_v26 = vand.u32 4294901760, %v3303_v3 }
  0x9c   :  { %863 = vmatmul.mubr.f32.vlgmr.msra.gmra.mrb[4].mxu0 %v2990_v29  ;;  %2458 = vmatpush3.bf16.msra.mxu1 %v3823_v55  ;;  %3844 = vst [vmem:[#allocation23_spill] sm:$0xff] %v3365_v4  ;;  %v3374_v55 = vsub.f32 %v82_v18, %v1003_v28  ;;  %v2505_v56 = vpack.c.bf16 %v1124_v60, %v1117_v11  ;;  %v3390_v18 = vld [vmem:[#allocation5 + $0x168] sm:$0xff] }
  0x9d   :  { %2466 = vmatpush3.bf16.msra.mxu0 %v3208_v44  ;;  %2460 = vmatprep.subr.bf16.mxu1 %v3824_v1  ;;  %v3370_v1 = vsub.f32 %v99_v27, %v1054_v16  ;;  %v3766_v44 = vand.u32 4294901760, %v3355_v48  ;;  %v1130_v47 = vsub.f32 %v3299_v24, %v3846_v59  ;;  %v1137_v51 = vsub.f32 %v3303_v3, %v3847_v26 }
  0x9e   :  { %2468 = vmatprep.subr.bf16.mxu0 %v3215_v53  ;;  %1073 = vmatprep.mubr.f32.mxu0 %v1072_v63  ;;  %v3385_v30 = vpack.c.bf16 %v1006_v8, %v1003_v28  ;;  %v1263_v59 = vsub.f32 %v3326_v14, %v3763_v62  ;;  %v3401_v28 = vld [vmem:[#allocation5 + $0x1f8] sm:$0xff]  ;;  %v3405_v16 = vsub.f32 %v83_v10, %v1006_v8  ;;  %v3850_v10 = vand.u32 4294901760, %v3368_v13 }
  0x9f   :  { %3845 = vst [vmem:[#allocation24_spill] sm:$0xff] %v3370_v1  ;;  %v3410_v63 = vsub.f32 %v3355_v48, %v3766_v44  ;;  %v1131_v60 = vand.u32 4294901760, %v1130_v47  ;;  %v1138_v26 = vand.u32 4294901760, %v1137_v51  ;;  %v3432_v47 = vld [vmem:[#allocation5 + $0x178] sm:$0xff]  ;;  %v3851_v44 = vand.u32 4294901760, %v3330_v39 }
  0xa0   :  { %2462 = vmatpush3.bf16.msra.mxu1 %v3826_v52  ;;  %v3848_v52 = vand.u32 4294901760, %v3324_v42  ;;  %v1264_v51 = vand.u32 4294901760, %v1263_v59  ;;  %v3853_v62 = vand.u32 4294901760, %v3365_v4 }
  0xa1   :  { %2470 = vmatpush3.bf16.msra.mxu0 %v3230_v0  ;;  %2496 = vmatprep.subr.bf16.mxu1 %v3278_v19  ;;  %v3399_v19 = vld [vmem:[#allocation5 + $0x1f0] sm:$0xff]  ;;  %v3858_v0 = vand.u32 4294901760, %v3405_v16 }
  0xa2   :  { %v1256_v27 = vsub.f32 %v3324_v42, %v3848_v52  ;;  %2472 = vmatprep.subr.bf16.mxu0 %v3248_v6  ;;  %v2507_v52 = vpack.c.bf16 %v1250_v23, %v1243_v17  ;;  %v3849_v6 = vand.u32 4294901760, %v3359_v49  ;;  %v1270_v17 = vsub.f32 %v3365_v4, %v3853_v62 }
  0xa3   :  { %967 = vmatmul.mubr.f32.vlgmr.msra.gmra.mrb[4].mxu1 %v2990_v29  ;;  %v1012_v29 = vand.u32 4294901760, %v3390_v18  ;;  %v3854_v23 = vand.u32 4294901760, %v3370_v1  ;;  %v1018_v62 = vand.u32 4294901760, %v3432_v47 }
  0xa4   :  { %2498 = vmatpush3.bf16.msra.mxu1 %v3291_v41  ;;  %v3417_v11 = vsub.f32 %v3359_v49, %v3849_v6  ;;  %1309 = vmatprep.mubr.f32.mxu1 %v3236_v58  ;;  %v1257_v8 = vand.u32 4294901760, %v1256_v27  ;;  %v3426_v41 = vsub.f32 %v3368_v13, %v3850_v10  ;;  %v3430_v6 = vld [vmem:[#allocation5 + $0x170] sm:$0xff]  ;;  %v3852_v27 = vand.u32 4294901760, %v3351_v20 }
  0xa5   :  { %2474 = vmatpush3.bf16.msra.mxu0 %v3255_v34  ;;  %2500 = vmatprep.subr.bf16.mxu1 %v3320_v40  ;;  %v1144_v40 = vsub.f32 %v3330_v39, %v3851_v44  ;;  %v1277_v58 = vsub.f32 %v3370_v1, %v3854_v23  ;;  %v2509_v44 = vpack.c.bf16 %v1138_v26, %v1131_v60  ;;  %v3855_v23 = vand.u32 4294901760, %v3399_v19 }
  0xa6   :  { %2476 = vmatprep.subr.bf16.mxu0 %v3280_v57  ;;  %v1151_v10 = vsub.f32 %v3351_v20, %v3852_v27  ;;  %v3450_v57 = vand.u32 4294901760, %v3203_v25  ;;  %v3454_v27 = vsub.f32 %v3390_v18, %v1012_v29  ;;  %v1015_v20 = vand.u32 4294901760, %v3430_v6 }
  0xa7   :  { %v3462_v59 = vsub.f32 %v3399_v19, %v3855_v23  ;;  %v3856_v34 = vand.u32 4294901760, %v3401_v28  ;;  %v2511_v60 = vpack.c.bf16 %v1264_v51, %v1257_v8  ;;  %v1145_v1 = vand.u32 4294901760, %v1144_v40 }
  0xa8   :  { %2502 = vmatpush3.bf16.msra.mxu1 %v3339_v5  ;;  %v1278_v4 = vand.u32 4294901760, %v1277_v58  ;;  %v3857_v39 = vand.u32 4294901760, %v3374_v55  ;;  %v3480_v18 = vsub.f32 %v3203_v25, %v3450_v57  ;;  %v3483_v26 = vsub.f32 %v3430_v6, %v1015_v20 }
  0xa9   :  { %2478 = vmatpush3.bf16.msra.mxu0 %v3297_v12  ;;  %2504 = vmatprep.subr.bf16.mxu1 %v2503_v61  ;;  %v3467_v5 = vsub.f32 %v3401_v28, %v3856_v34  ;;  %v1152_v12 = vand.u32 4294901760, %v1151_v10  ;;  %v1271_v61 = vand.u32 4294901760, %v1270_v17  ;;  %v1165_v34 = vsub.f32 %v3405_v16, %v3858_v0 }
  0xaa   :  { %2480 = vmatprep.subr.bf16.mxu0 %v3322_v9  ;;  %v1158_v23 = vsub.f32 %v3374_v55, %v3857_v39  ;;  %v3486_v8 = vsub.f32 %v3432_v47, %v1018_v62  ;;  %v3859_v0 = vand.u32 4294901760, %v3410_v63  ;;  %v3860_v25 = vand.u32 4294901760, %v3417_v11 }
  0xab   :  { %v3861_v51 = vand.u32 4294901760, %v3355_v48  ;;  %v3862_v40 = vand.u32 4294901760, %v3359_v49  ;;  %v2515_v58 = vpack.c.bf16 %v1278_v4, %v1271_v61  ;;  %v1076_v6 = vand.u32 4294901760, %v3480_v18 }
  0xac   :  { %2506 = vmatpush3.bf16.msra.mxu1 %v2505_v56  ;;  %v1284_v39 = vsub.f32 %v3410_v63, %v3859_v0  ;;  %v1291_v56 = vsub.f32 %v3417_v11, %v3860_v25  ;;  %v2513_v0 = vpack.c.bf16 %v1152_v12, %v1145_v1  ;;  %v1166_v25 = vand.u32 4294901760, %v1165_v34 }
  0xad   :  { %2482 = vmatpush3.bf16.msra.mxu0 %v3341_v15  ;;  %2508 = vmatprep.subr.bf16.mxu1 %v2507_v52  ;;  %v3504_v10 = vpack.c.bf16 %v3862_v40, %v3861_v51  ;;  %v3863_v52 = vand.u32 4294901760, %v3368_v13  ;;  %v1159_v15 = vand.u32 4294901760, %v1158_v23  ;;  %v3864_v47 = vand.u32 4294901760, %v3426_v41 }
  0xae   :  { %2484 = vmatprep.subr.bf16.mxu0 %v3363_v50  ;;  %v3865_v48 = vand.u32 4294901760, %v3454_v27  ;;  %v1185_v51 = vand.u32 4294901760, %v3483_v26  ;;  %v1192_v13 = vand.u32 4294901760, %v3486_v8  ;;  %v1285_v12 = vand.u32 4294901760, %v1284_v39 }
  0xaf   :  { %v3508_v17 = vpack.c.bf16 %v1012_v29, %v3863_v52  ;;  %v1172_v50 = vsub.f32 %v3426_v41, %v3864_v47  ;;  %v1292_v4 = vand.u32 4294901760, %v1291_v56  ;;  %v3866_v1 = vand.u32 4294901760, %v3462_v59 }
  0xb0   :  { %2510 = vmatpush3.bf16.msra.mxu1 %v2509_v44  ;;  %v1179_v49 = vsub.f32 %v3454_v27, %v3865_v48  ;;  %v3867_v44 = vand.u32 4294901760, %v3467_v5  ;;  %v3868_v23 = vand.u32 4294901760, %v3399_v19  ;;  %v3869_v34 = vand.u32 4294901760, %v3401_v28 }
  0xb1   :  { %2486 = vmatpush3.bf16.msra.mxu0 %v3385_v30  ;;  %2512 = vmatprep.subr.bf16.mxu1 %v2511_v60  ;;  %v1298_v29 = vsub.f32 %v3462_v59, %v3866_v1  ;;  %v2517_v40 = vpack.c.bf16 %v1166_v25, %v1159_v15  ;;  %v1077_v60 = vsub.f32 %v3480_v18, %v1076_v6  ;;  %v1173_v39 = vand.u32 4294901760, %v1172_v50 }
  0xb2   :  { %v1305_v61 = vsub.f32 %v3467_v5, %v3867_v44  ;;  %2488 = vmatprep.subr.bf16.mxu0 %v3504_v10  ;;  %v3531_v47 = vpack.c.bf16 %v3869_v34, %v3868_v23  ;;  %v1180_v56 = vand.u32 4294901760, %v1179_v49  ;;  %v1186_v52 = vsub.f32 %v3483_v26, %v1185_v51  ;;  %v3870_v23 = vld [vmem:[#allocation17_spill] sm:$0xff] }
  0xb3   :  { %v1193_v19 = vsub.f32 %v3486_v8, %v1192_v13  ;;  %v3543_v28 = vpack.c.bf16 %v1018_v62, %v1015_v20  ;;  %v2519_v15 = vpack.c.bf16 %v1292_v4, %v1285_v12  ;;  %v1299_v25 = vand.u32 4294901760, %v1298_v29 }
  0xb4   :  { %2514 = vmatpush3.bf16.msra.mxu1 %v2513_v0  ;;  %v1306_v48 = vand.u32 4294901760, %v1305_v61  ;;  %v2527_v50 = vpack.c.bf16 %v3170_v36, %v3168_v54  ;;  %v1078_v0 = vand.u32 4294901760, %v1077_v60  ;;  %v2521_v49 = vpack.c.bf16 %v1180_v56, %v1173_v39 }
  0xb5   :  { %2490 = vmatpush3.bf16.msra.mxu0 %v3508_v17  ;;  %2516 = vmatprep.subr.bf16.mxu1 %v2515_v58  ;;  %v1187_v1 = vand.u32 4294901760, %v1186_v52  ;;  %v1194_v44 = vand.u32 4294901760, %v1193_v19  ;;  %v2529_v20 = vpack.c.bf16 %v3177_v32, %v3175_v31  ;;  %v2531_v58 = vpack.c.bf16 %v3217_v38, %v3210_v35  ;;  %v3873_v52 = vld [vmem:[#allocation16_spill] sm:$0xff]  ;;  %v3874_v19 = vld [vmem:[#allocation13_spill] sm:$0xff] }
  0xb6   :  { %2492 = vmatprep.subr.bf16.mxu0 %v3531_v47  ;;  %v2523_v62 = vpack.c.bf16 %v1306_v48, %v1299_v25  ;;  %v2533_v4 = vpack.c.bf16 %v3234_v43, %v3232_v46  ;;  %v2535_v29 = vpack.c.bf16 %v3250_v21, %v3238_v37  ;;  %v2537_v61 = vpack.c.bf16 %v3260_v2, %v3258_v45  ;;  %v3876_v25 = vld [vmem:[#allocation21_spill] sm:$0xff] }
  0xb7   :  { %v2525_v12 = vpack.c.bf16 %v1194_v44, %v1187_v1  ;;  %v2539_v34 = vpack.c.bf16 %v3870_v23, %v3271_v33  ;;  %v3872_v60 = vand.u32 4294901760, %v3264_v7  ;;  %v2541_v39 = vpack.c.bf16 %v3303_v3, %v3299_v24  ;;  %v3880_v1 = vld [vmem:[#allocation14_spill] sm:$0xff] }
  0xb8   :  { %2518 = vmatpush3.bf16.msra.mxu1 %v2517_v40  ;;  %v3871_v40 = vld [vmem:[#allocation11_spill] sm:$0xff]  ;;  %v2543_v56 = vpack.c.bf16 %v3326_v14, %v3324_v42  ;;  %v2549_v44 = vpack.c.bf16 %v3405_v16, %v3374_v55 }
  0xb9   :  { %2494 = vmatpush3.bf16.msra.mxu0 %v3543_v28  ;;  %2520 = vmatprep.subr.bf16.mxu1 %v2519_v15  ;;  %v3875_v15 = vld [vmem:[#allocation19_spill] sm:$0xff] }
  0xba   :  { %2528 = vmatprep.subr.bf16.mxu0 %v2527_v50  ;;  %v2545_v48 = vpack.c.bf16 %v3876_v25, %v3875_v15  ;;  %v3878_v50 = vld [vmem:[#allocation24_spill] sm:$0xff] }
  0xbc   :  { %1079 = vmatmul.mubr.f32.vlgmr.msra.gmra.mrb[6].mxu0 %v1078_v0  ;;  %2522 = vmatpush3.bf16.msra.mxu1 %v2521_v49  ;;  %v3879_v49 = vld [vmem:[#allocation15_spill] sm:$0xff] }
  0xbd   :  { %2530 = vmatpush3.bf16.msra.mxu0 %v2529_v20  ;;  %2524 = vmatprep.subr.bf16.mxu1 %v2523_v62  ;;  %v2551_v20 = vpack.c.bf16 %v3417_v11, %v3410_v63  ;;  %v3881_v62 = vld [vmem:[#allocation18_spill] sm:$0xff] }
  0xbe   :  { %2532 = vmatprep.subr.bf16.mxu0 %v2531_v58  ;;  %1446 = vmatprep.mubr.f32.mxu0 %v3264_v7  ;;  %v3877_v7 = vld [vmem:[#allocation23_spill] sm:$0xff]  ;;  %v2553_v58 = vpack.c.bf16 %v3454_v27, %v3426_v41 }
  0xbf   :  { %v2547_v0 = vpack.c.bf16 %v3878_v50, %v3877_v7 }
  0xc0   :  { %2526 = vmatpush3.bf16.msra.mxu1 %v2525_v12  ;;  %v2555_v12 = vpack.c.bf16 %v3467_v5, %v3462_v59 }
  0xc1   :  { %2534 = vmatpush3.bf16.msra.mxu0 %v2533_v4  ;;  %2560 = vmatprep.subr.bf16.mxu1 %v3206_v22  ;;  %v3882_v4 = vld [vmem:[#allocation20_spill] sm:$0xff] }
  0xc2   :  { %2536 = vmatprep.subr.bf16.mxu0 %v2535_v29  ;;  %v3883_v29 = vld [vmem:[#allocation22_spill] sm:$0xff] }
  0xc3   :  { %1311 = vmatmul.mubr.f32.vlgmr.msra.gmra.mrb[6].mxu1 %v3450_v57 }
  0xc4   :  { %2562 = vmatpush3.bf16.msra.mxu1 %v3871_v40  ;;  %1553 = vmatprep.mubr.f32.mxu1 %v3872_v60  ;;  %v3885_v60 = vand.u32 4294901760, %v3170_v36  ;;  %v3891_v36 = vand.u32 4294901760, %v3234_v43  ;;  %v3897_v43 = vand.u32 4294901760, %v3271_v33  ;;  %v3902_v33 = vand.u32 4294901760, %v3326_v14 }
  0xc5   :  { %2538 = vmatpush3.bf16.msra.mxu0 %v2537_v61  ;;  %2564 = vmatprep.subr.bf16.mxu1 %v3215_v53  ;;  %v2557_v61 = vpack.c.bf16 %v3486_v8, %v3483_v26  ;;  %v3908_v14 = vand.u32 4294901760, %v3405_v16  ;;  %v3914_v16 = vand.u32 4294901760, %v3467_v5 }
  0xc6   :  { %2540 = vmatprep.subr.bf16.mxu0 %v2539_v34  ;;  %v3884_v34 = vand.u32 4294901760, %v3168_v54  ;;  %v3890_v54 = vand.u32 4294901760, %v3232_v46  ;;  %v3896_v46 = vand.u32 4294901760, %v3260_v2  ;;  %v3901_v2 = vand.u32 4294901760, %v3324_v42 }
  0xc7   :  { %v3907_v42 = vand.u32 4294901760, %v3374_v55  ;;  %v3913_v55 = vand.u32 4294901760, %v3462_v59 }
  0xc8   :  { %2566 = vmatpush3.bf16.msra.mxu1 %v3873_v52 }
  0xc9   :  { %2542 = vmatpush3.bf16.msra.mxu0 %v2541_v39  ;;  %2568 = vmatprep.subr.bf16.mxu1 %v3874_v19  ;;  %v2591_v39 = vpack.c.bf16 %v3885_v60, %v3884_v34 }
  0xca   :  { %2544 = vmatprep.subr.bf16.mxu0 %v2543_v56  ;;  %v3886_v56 = vand.u32 4294901760, %v3175_v31  ;;  %v2597_v31 = vpack.c.bf16 %v3891_v36, %v3890_v54 }
  0xcc   :  { %2570 = vmatpush3.bf16.msra.mxu1 %v3879_v49 }
  0xcd   :  { %2546 = vmatpush3.bf16.msra.mxu0 %v2545_v48  ;;  %2572 = vmatprep.subr.bf16.mxu1 %v3880_v1  ;;  %v3887_v48 = vand.u32 4294901760, %v3177_v32  ;;  %v3892_v32 = vand.u32 4294901760, %v3238_v37  ;;  %v3898_v37 = vand.u32 4294901760, %v3870_v23  ;;  %v2607_v23 = vpack.c.bf16 %v3902_v33, %v3901_v2 }
  0xce   :  { %2548 = vmatprep.subr.bf16.mxu0 %v2547_v0 }
  0xcf   :  { %v2593_v0 = vpack.c.bf16 %v3887_v48, %v3886_v56  ;;  %v2603_v60 = vpack.c.bf16 %v3898_v37, %v3897_v43 }
  0xd0   :  { %2574 = vmatpush3.bf16.msra.mxu1 %v3881_v62 }
  0xd1   :  { %2550 = vmatpush3.bf16.msra.mxu0 %v2549_v44  ;;  %2576 = vmatprep.subr.bf16.mxu1 %v3322_v9  ;;  %v3888_v44 = vand.u32 4294901760, %v3210_v35  ;;  %v3893_v35 = vand.u32 4294901760, %v3250_v21  ;;  %v3900_v21 = vand.u32 4294901760, %v3303_v3  ;;  %v3906_v3 = vand.u32 4294901760, %v3878_v50 }
  0xd2   :  { %2552 = vmatprep.subr.bf16.mxu0 %v2551_v20  ;;  %v3889_v20 = vand.u32 4294901760, %v3217_v38  ;;  %v3894_v38 = vld [vmem:[#allocation12_spill] sm:$0xff]  ;;  %v3912_v50 = vand.u32 4294901760, %v3454_v27 }
  0xd4   :  { %2578 = vmatpush3.bf16.msra.mxu1 %v3882_v4 }
  0xd5   :  { %2554 = vmatpush3.bf16.msra.mxu0 %v2553_v58  ;;  %2580 = vmatprep.subr.bf16.mxu1 %v3883_v29  ;;  %v2595_v58 = vpack.c.bf16 %v3889_v20, %v3888_v44 }
  0xd6   :  { %2556 = vmatprep.subr.bf16.mxu0 %v2555_v12  ;;  %v2599_v12 = vpack.c.bf16 %v3893_v35, %v3892_v32 }
  0xd8   :  { %2582 = vmatpush3.bf16.msra.mxu1 %v3385_v30 }
  0xd9   :  { %2558 = vmatpush3.bf16.msra.mxu0 %v2557_v61  ;;  %2584 = vmatprep.subr.bf16.mxu1 %v3504_v10  ;;  %v3895_v61 = vand.u32 4294901760, %v3258_v45 }
  0xda   :  { %2592 = vmatprep.subr.bf16.mxu0 %v2591_v39 }
  0xdb   :  { %v2601_v34 = vpack.c.bf16 %v3896_v46, %v3895_v61 }
  0xdc   :  { %1449 = vmatmul.mubr.f32.vlgmr.msra.gmra.mrb[8].mxu0 %v3480_v18  ;;  %2586 = vmatpush3.bf16.msra.mxu1 %v3508_v17  ;;  %v3903_v18 = vand.u32 4294901760, %v3875_v15  ;;  %v3910_v15 = vand.u32 4294901760, %v3417_v11 }
  0xdd   :  { %2594 = vmatpush3.bf16.msra.mxu0 %v2593_v0  ;;  %2588 = vmatprep.subr.bf16.mxu1 %v3531_v47 }
  0xde   :  { %2596 = vmatprep.subr.bf16.mxu0 %v2595_v58  ;;  %1723 = vmatprep.mubr.f32.mxu0 %v3894_v38 }
  0xe0   :  { %2590 = vmatpush3.bf16.msra.mxu1 %v3543_v28 }
  0xe1   :  { %2598 = vmatpush3.bf16.msra.mxu0 %v2597_v31  ;;  %2624 = vmatprep.subr.bf16.mxu1 %v3206_v22  ;;  %v3899_v22 = vand.u32 4294901760, %v3299_v24  ;;  %v3905_v24 = vand.u32 4294901760, %v3877_v7  ;;  %v3911_v7 = vand.u32 4294901760, %v3426_v41 }
  0xe2   :  { %2600 = vmatprep.subr.bf16.mxu0 %v2599_v12 }
  0xe3   :  { %1557 = vmatmul.mubr.f32.vlgmr.msra.gmra.mrb[8].mxu1 %v1076_v6  ;;  %v2605_v45 = vpack.c.bf16 %v3900_v21, %v3899_v22 }
  0xe4   :  { %2626 = vmatpush3.bf16.msra.mxu1 %v3871_v40  ;;  %1827 = vmatprep.mubr.f32.mxu1 %v3894_v38  ;;  %v2611_v40 = vpack.c.bf16 %v3906_v3, %v3905_v24 }
  0xe5   :  { %2602 = vmatpush3.bf16.msra.mxu0 %v2601_v34  ;;  %2628 = vmatprep.subr.bf16.mxu1 %v3215_v53  ;;  %v3904_v53 = vand.u32 4294901760, %v3876_v25 }
  0xe6   :  { %2604 = vmatprep.subr.bf16.mxu0 %v2603_v60 }
  0xe7   :  { %v2609_v6 = vpack.c.bf16 %v3904_v53, %v3903_v18 }
  0xe8   :  { %2630 = vmatpush3.bf16.msra.mxu1 %v3873_v52  ;;  %v2613_v52 = vpack.c.bf16 %v3908_v14, %v3907_v42 }
  0xe9   :  { %2606 = vmatpush3.bf16.msra.mxu0 %v2605_v45  ;;  %2632 = vmatprep.subr.bf16.mxu1 %v3874_v19  ;;  %v3909_v19 = vand.u32 4294901760, %v3410_v63 }
  0xea   :  { %2608 = vmatprep.subr.bf16.mxu0 %v2607_v23 }
  0xeb   :  { %v2615_v25 = vpack.c.bf16 %v3910_v15, %v3909_v19 }
  0xec   :  { %2634 = vmatpush3.bf16.msra.mxu1 %v3879_v49  ;;  %v2617_v49 = vpack.c.bf16 %v3912_v50, %v3911_v7 }
  0xed   :  { %2610 = vmatpush3.bf16.msra.mxu0 %v2609_v6  ;;  %2636 = vmatprep.subr.bf16.mxu1 %v3880_v1  ;;  %v2619_v1 = vpack.c.bf16 %v3914_v16, %v3913_v55 }
  0xee   :  { %2612 = vmatprep.subr.bf16.mxu0 %v2611_v40 }
  0xf0   :  { %2638 = vmatpush3.bf16.msra.mxu1 %v3881_v62 }
  0xf1   :  { %2614 = vmatpush3.bf16.msra.mxu0 %v2613_v52  ;;  %2640 = vmatprep.subr.bf16.mxu1 %v3322_v9  ;;  %v2621_v9 = vpack.c.bf16 %v1192_v13, %v1185_v51 }
  0xf2   :  { %2616 = vmatprep.subr.bf16.mxu0 %v2615_v25 }
  0xf4   :  { %2642 = vmatpush3.bf16.msra.mxu1 %v3882_v4 }
  0xf5   :  { %2618 = vmatpush3.bf16.msra.mxu0 %v2617_v49  ;;  %2644 = vmatprep.subr.bf16.mxu1 %v3883_v29 }
  0xf6   :  { %2620 = vmatprep.subr.bf16.mxu0 %v2619_v1 }
  0xf8   :  { %2646 = vmatpush3.bf16.msra.mxu1 %v3385_v30 }
  0xf9   :  { %2622 = vmatpush3.bf16.msra.mxu0 %v2621_v9  ;;  %2648 = vmatprep.subr.bf16.mxu1 %v3504_v10 }
  0xfc   :  { %1725 = vmatmul.mubr.f32.vlgmr.msra.gmra.mrb[10].mxu0 %v3450_v57  ;;  %2650 = vmatpush3.bf16.msra.mxu1 %v3508_v17 }
  0xfd   :  { %2652 = vmatprep.subr.bf16.mxu1 %v3531_v47 }
 0x100   :  { %2654 = vmatpush3.bf16.msra.mxu1 %v3543_v28 }
 0x103   :  { %1829 = vmatmul.mubr.f32.vlgmr.msra.gmra.mrb[10].mxu1 %v3450_v57 }
 0x12f   :  { %v1883_v63 = vpop.f32.mrb[0].mxu0 }
 0x130   :  { %v1884_v11 = vpop.f32.mrb[1].mxu0 }
 0x131   :  { %v1885_v41 = vadd.f32 %v1884_v11, %v1883_v63 }
 0x136   :  { %v1918_v59 = vpop.f32.mrb[0].mxu1 }
 0x137   :  { %v1919_v27 = vpop.f32.mrb[1].mxu1 }
 0x138   :  { %v1920_v5 = vadd.f32 %v1919_v27, %v1918_v59 }
 0x13a   :  { %v451_v30 = vadd.f32 %v1920_v5, %v1885_v41 }
 0x14f   :  { %v1953_v26 = vpop.f32.mrb[2].mxu0 }
 0x150   :  { %v1954_v8 = vpop.f32.mrb[3].mxu0 }
 0x151   :  { %v1955_v10 = vadd.f32 %v1954_v8, %v1953_v26 }
 0x153   :  { %v589_v51 = vadd.f32 %v1955_v10, %v451_v30 }
 0x156   :  { %v1988_v13 = vpop.f32.mrb[2].mxu1 }
 0x157   :  { %v1989_v62 = vpop.f32.mrb[3].mxu1 }
 0x158   :  { %v1990_v17 = vadd.f32 %v1989_v62, %v1988_v13 }
 0x15a   :  { %v697_v4 = vadd.f32 %v1990_v17, %v589_v51 }
 0x16f   :  { %v2023_v47 = vpop.f32.mrb[4].mxu0 }
 0x170   :  { %v2024_v29 = vpop.f32.mrb[5].mxu0 }
 0x171   :  { %v2025_v28 = vadd.f32 %v2024_v29, %v2023_v47 }
 0x173   :  { %v865_v39 = vadd.f32 %v2025_v28, %v697_v4 }
 0x176   :  { %v2058_v57 = vpop.f32.mrb[4].mxu1 }
 0x177   :  { %v2059_v56 = vpop.f32.mrb[5].mxu1 }
 0x178   :  { %v2060_v48 = vadd.f32 %v2059_v56, %v2058_v57 }
 0x17a   :  { %v969_v0 = vadd.f32 %v2060_v48, %v865_v39 }
 0x18f   :  { %v2093_v44 = vpop.f32.mrb[6].mxu0 }
 0x190   :  { %v2094_v20 = vpop.f32.mrb[7].mxu0 }
 0x191   :  { %v2095_v58 = vadd.f32 %v2094_v20, %v2093_v44 }
 0x193   :  { %v1081_v54 = vadd.f32 %v2095_v58, %v969_v0 }
 0x196   :  { %v2128_v36 = vpop.f32.mrb[6].mxu1 }
 0x197   :  { %v2129_v31 = vpop.f32.mrb[7].mxu1 }
 0x198   :  { %v2130_v32 = vadd.f32 %v2129_v31, %v2128_v36 }
 0x19a   :  { %v1313_v35 = vadd.f32 %v2130_v32, %v1081_v54 }
 0x1af   :  { %v2163_v12 = vpop.f32.mrb[8].mxu0 }
 0x1b0   :  { %v2164_v38 = vpop.f32.mrb[9].mxu0 }
 0x1b1   :  { %v2165_v61 = vadd.f32 %v2164_v38, %v2163_v12 }
 0x1b3   :  { %v1451_v46 = vadd.f32 %v2165_v61, %v1313_v35 }
 0x1b6   :  { %v2198_v34 = vpop.f32.mrb[8].mxu1 }
 0x1b7   :  { %v2199_v43 = vpop.f32.mrb[9].mxu1 }
 0x1b8   :  { %v2200_v37 = vadd.f32 %v2199_v43, %v2198_v34 }
 0x1ba   :  { %v1559_v60 = vadd.f32 %v2200_v37, %v1451_v46 }
 0x1cf   :  { %v2233_v22 = vpop.f32.mrb[10].mxu0 }
 0x1d0   :  { %v2234_v21 = vpop.f32.mrb[11].mxu0 }
 0x1d1   :  { %v2235_v45 = vadd.f32 %v2234_v21, %v2233_v22 }
 0x1d3   :  { %v1727_v2 = vadd.f32 %v2235_v45, %v1559_v60 }
 0x1d6   :  { %v2268_v33 = vpop.f32.mrb[10].mxu1 }
 0x1d7   :  { %v2269_v23 = vpop.f32.mrb[11].mxu1 }
 0x1d8   :  { %v2270_v18 = vadd.f32 %v2269_v23, %v2268_v33 }
 0x1da   :  { %v1831_v53 = vadd.f32 %v2270_v18, %v1727_v2 }
 0x1dc   :  { %1834 = vst [vmem:[#allocation7] sm:$0xf] %v1831_v53 }
 0x1dd   :  { %2717 = shalt.err (!%p2714_p6)
}
 0x1de   :  { %s2718_s10 = scalar_lea.hbm %s3700_s2, 64 }
 0x1df   :  { %p2719_p7 = scmp.ne.s32.totalorder %s3700_s2, %s2718_s10  ;;  %p2722_p8 = scmp.lt.u32.totalorder %s2718_s10, %s3700_s2 }
 0x1e1   :  { %p2724_p9 = pnand %p2722_p8, %p2719_p7 }
 0x1e3   :  { %2727 = shalt.err (!%p2724_p9)
}
 0x1e4   :  { %1844 = dma.vmem_to_hbm [thread:$0]  %s1842_s6, 64, %s3700_s2, [#allocation4]  }
 0x1e5   :  { %2732 = dma.done.wait [#allocation4], 64  }
 0x1e6   :  { %2733 = vsyncadd [#allocation4], 4294967232 }
 0x1e7   :  { %1848 = vsyncpa [#allocation3], 1 }
 0x1e8   :  { %1849 = vsyncpa [#allocation6], 1 }
 0x1e9   :  { %1850 = vsyncpa [#allocation4], 1 }

</bundles_post_ra>
